<compile_context>
chip_gen: v6e
topology: v6e:2x2x1
jax: 0.10.0
libtpu: 0.0.40
codegen_flags: <defaults>
</compile_context>

<pallas_src>
import functools

import jax
import jax.numpy as jnp
from jax import lax
from jax.experimental import pallas as pl
from jax.experimental.pallas import tpu as pltpu

LEAKY_SLOPE = 0.01  # F.leaky_relu default negative_slope
NORM_EPS = 1e-12    # F.normalize default eps


def _leaky_relu(x):
    return jnp.where(x >= 0, x, LEAKY_SLOPE * x)


def _round_up(n, m):
    return ((n + m - 1) // m) * m


def _ngcf_kernel(a_ref, ego_k_ref, ego_row_ref,
                 w_gc_ref, b_gc_ref, w_bi_ref, b_bi_ref,
                 out_ref, side_acc_ref):
    k = pl.program_id(1)

    @pl.when(k == 0)
    def _init():
        side_acc_ref[...] = jnp.zeros_like(side_acc_ref)

    # side_embeddings partial: (tile_m, tile_k) bf16 @ (tile_k, D) bf16 -> f32
    side_acc_ref[...] += jnp.dot(a_ref[...], ego_k_ref[...],
                                 preferred_element_type=jnp.float32)

    @pl.when(k == pl.num_programs(1) - 1)
    def _epilogue():
        side = side_acc_ref[...]
        ego_tile = ego_row_ref[...]  # f32 row tile

        # sum_embeddings = leaky_relu(side @ W_gc + b_gc)
        sum_emb = _leaky_relu(
            jnp.dot(side, w_gc_ref[...], preferred_element_type=jnp.float32)
            + b_gc_ref[...])

        # bi_embeddings = leaky_relu((ego * side) @ W_bi + b_bi)
        bi_emb = _leaky_relu(
            jnp.dot(ego_tile * side, w_bi_ref[...],
                    preferred_element_type=jnp.float32)
            + b_bi_ref[...])

        e = sum_emb + bi_emb

        # F.normalize(e, p=2, dim=1) == e / max(||e||_2, eps); rsqrt -> EUP
        ss = jnp.sum(e * e, axis=1, keepdims=True)
        norm = e * lax.rsqrt(jnp.maximum(ss, NORM_EPS * NORM_EPS))

        # fused all_embeddings = cat([ego, norm], dim=1): single lane-dense store
        out_ref[...] = jnp.concatenate(
            [ego_tile, norm], axis=1).astype(out_ref.dtype)


@functools.partial(jax.jit, static_argnames=("tile_m", "tile_k"))
def ngcf_gcn_forward(a_hat, ego, w_gc, b_gc, w_bi, b_bi,
                     *, tile_m=256, tile_k=512):
    """Returns all_embeddings = concat([ego, norm_emb], dim=1), shape (N, D+D1).
    User/item split is trivial slicing done by the caller."""
    n_total, d = ego.shape
    d1 = w_gc.shape[1]

    # Clamp tiles for small problems (collapses toy shapes to few grid steps)
    # while keeping bf16 sublane (x16) / lane (x128) alignment.
    tile_m = min(tile_m, _round_up(n_total, 16))
    tile_k = min(tile_k, _round_up(n_total, 128))

    np_m = _round_up(n_total, tile_m)   # padded rows of A / output
    np_k = _round_up(n_total, tile_k)   # padded cols of A / rows of ego K-view

    # bf16 copies feed the bandwidth-dominant A_hat @ ego matmul; the f32 row
    # tile keeps the bi-term and the fused concat in full precision.
    a_pad = jnp.zeros((np_m, np_k), jnp.bfloat16).at[:n_total, :n_total].set(
        a_hat.astype(jnp.bfloat16))
    ego_k = jnp.zeros((np_k, d), jnp.bfloat16).at[:n_total].set(
        ego.astype(jnp.bfloat16))
    ego_row = jnp.zeros((np_m, d), jnp.float32).at[:n_total].set(
        ego.astype(jnp.float32))

    grid = (np_m // tile_m, np_k // tile_k)

    out_padded = pl.pallas_call(
        _ngcf_kernel,
        out_shape=jax.ShapeDtypeStruct((np_m, d + d1), jnp.float32),
        grid_spec=pltpu.PrefetchScalarGridSpec(
            num_scalar_prefetch=0,
            grid=grid,
            in_specs=[
                pl.BlockSpec((tile_m, tile_k), lambda i, k: (i, k)),  # A tile
                pl.BlockSpec((tile_k, d), lambda i, k: (k, 0)),       # ego K blk
                pl.BlockSpec((tile_m, d), lambda i, k: (i, 0)),       # ego row
                pl.BlockSpec((d, d1), lambda i, k: (0, 0)),           # W_gc_1
                pl.BlockSpec((1, d1), lambda i, k: (0, 0)),           # b_gc_1
                pl.BlockSpec((d, d1), lambda i, k: (0, 0)),           # W_bi_1
                pl.BlockSpec((1, d1), lambda i, k: (0, 0)),           # b_bi_1
            ],
            out_specs=pl.BlockSpec((tile_m, d + d1), lambda i, k: (i, 0)),
            scratch_shapes=[pltpu.VMEM((tile_m, d), jnp.float32)],
        ),
        compiler_params=pltpu.CompilerParams(
            dimension_semantics=("parallel", "arbitrary"),
            vmem_limit_bytes=64 * 1024 * 1024),
    )(a_pad, ego_k, ego_row, w_gc, b_gc, w_bi, b_bi)

    return out_padded[:n_total]


def xavier_normal(key, shape, dtype=jnp.float32):
    fan_in, fan_out = shape[0], shape[1]
    std = (2.0 / (fan_in + fan_out)) ** 0.5
    return std * jax.random.normal(key, shape, dtype=dtype)


def build_norm_adj(key, n_users, n_items, density=0.1):
    """Dense stand-in for the NGCF normalized adjacency:
    A = [[0, R], [R^T, 0]],  A_hat = D^{-1/2} A D^{-1/2}."""
    r = (jax.random.uniform(key, (n_users, n_items)) < density).astype(jnp.float32)
    top = jnp.concatenate(
        [jnp.zeros((n_users, n_users), jnp.float32), r], axis=1)
    bot = jnp.concatenate(
        [r.T, jnp.zeros((n_items, n_items), jnp.float32)], axis=1)
    a = jnp.concatenate([top, bot], axis=0)
    deg = jnp.sum(a, axis=1)
    d_inv_sqrt = jnp.where(deg > 0, 1.0 / jnp.sqrt(jnp.maximum(deg, 1e-12)), 0.0)
    return a * d_inv_sqrt[:, None] * d_inv_sqrt[None, :]


if __name__ == "__main__":
    # Small, TPU-friendly sizes consistent with the module. N = 236 is NOT a
    # tile multiple, exercising the padding path.
    n_users, n_items = 96, 140          # N = 236
    emb_dim = 32                        # args.embed_size
    layer_size = [32]                   # eval(args.layer_size) -> weight_size
    n_total = n_users + n_items
    d1 = layer_size[0]

    key = jax.random.PRNGKey(0)
    k_adj, k_ue, k_ie, k_wgc, k_bgc, k_wbi, k_bbi = jax.random.split(key, 7)

    a_hat = build_norm_adj(k_adj, n_users, n_items)
    user_embedding = xavier_normal(k_ue, (n_users, emb_dim))
    item_embedding = xavier_normal(k_ie, (n_items, emb_dim))
    w_gc_1 = xavier_normal(k_wgc, (emb_dim, d1))
    b_gc_1 = xavier_normal(k_bgc, (1, d1))
    w_bi_1 = xavier_normal(k_wbi, (emb_dim, d1))
    b_bi_1 = xavier_normal(k_bbi, (1, d1))

    # ego_embeddings = cat([user_embedding, item_embedding], dim=0)  (glue)
    ego = jnp.concatenate([user_embedding, item_embedding], axis=0)

    # Small tiles here so the multi-step (row x K) grid path is exercised.
    all_embeddings = ngcf_gcn_forward(
        a_hat, ego, w_gc_1, b_gc_1, w_bi_1, b_bi_1, tile_m=128, tile_k=128)
    all_embeddings = jax.block_until_ready(all_embeddings)

    # split into user / item blocks (glue)
    u_g_embeddings = all_embeddings[:n_users]
    i_g_embeddings = all_embeddings[n_users:]
    assert u_g_embeddings.shape == (n_users, emb_dim + d1)
    assert i_g_embeddings.shape == (n_items, emb_dim + d1)

    # Pure-JAX reference of the same math (bf16 rounding applied to the
    # A_hat @ ego operands, matching the kernel's bf16 MXU path).
    a_bf = a_hat.astype(jnp.bfloat16).astype(jnp.float32)
    ego_bf = ego.astype(jnp.bfloat16).astype(jnp.float32)
    side_ref = a_bf @ ego_bf
    sum_ref = jax.nn.leaky_relu(side_ref @ w_gc_1 + b_gc_1, LEAKY_SLOPE)
    bi_ref = jax.nn.leaky_relu((ego * side_ref) @ w_bi_1 + b_bi_1, LEAKY_SLOPE)
    e_ref = sum_ref + bi_ref
    norm_ref = e_ref / jnp.maximum(
        jnp.sqrt(jnp.sum(e_ref * e_ref, axis=1, keepdims=True)), NORM_EPS)
    all_ref = jnp.concatenate([ego, norm_ref], axis=1)

    assert jnp.allclose(all_embeddings, all_ref, atol=1e-3, rtol=1e-3), (
        float(jnp.max(jnp.abs(all_embeddings - all_ref))))

    print("KERNEL_OK")
</pallas_src>

<mosaic_0001>
module attributes {stable_mosaic.version = 11 : i64} {
  func.func @_ngcf_kernel(%arg0: i32, %arg1: i32, %arg2: memref<128x128xbf16, #tpu.memory_space<vmem>>, %arg3: memref<128x32xbf16, #tpu.memory_space<vmem>>, %arg4: memref<128x32xf32, #tpu.memory_space<vmem>>, %arg5: memref<32x32xf32, #tpu.memory_space<vmem>>, %arg6: memref<1x32xf32, #tpu.memory_space<vmem>>, %arg7: memref<32x32xf32, #tpu.memory_space<vmem>>, %arg8: memref<1x32xf32, #tpu.memory_space<vmem>>, %arg9: memref<128x64xf32, #tpu.memory_space<vmem>>, %arg10: memref<128x32xf32, #tpu.memory_space<vmem>>) attributes {dimension_semantics = [#tpu.dimension_semantics<parallel>, #tpu.dimension_semantics<arbitrary>], iteration_bounds = array<i64: 2, 2>, scalar_prefetch = 0 : i64, scratch_operands = 1 : i64, tpu.core_type = #tpu.core_type<tc>, window_params = [{transform_indices = @transform_0, window_bounds = array<i64: 128, 128>}, {transform_indices = @transform_1, window_bounds = array<i64: 128, 32>}, {transform_indices = @transform_2, window_bounds = array<i64: 128, 32>}, {pipeline_mode = #tpu.pipeline_mode<synchronous>, transform_indices = @transform_3, window_bounds = array<i64: 32, 32>}, {pipeline_mode = #tpu.pipeline_mode<synchronous>, transform_indices = @transform_4, window_bounds = array<i64: 1, 32>}, {pipeline_mode = #tpu.pipeline_mode<synchronous>, transform_indices = @transform_5, window_bounds = array<i64: 32, 32>}, {pipeline_mode = #tpu.pipeline_mode<synchronous>, transform_indices = @transform_6, window_bounds = array<i64: 1, 32>}, {transform_indices = @transform_7, window_bounds = array<i64: 128, 64>}]} {
    %c0_i32 = arith.constant 0 : i32
    %0 = arith.cmpi eq, %arg1, %c0_i32 : i32
    %1 = arith.extui %0 : i1 to i32
    %c0_i32_0 = arith.constant 0 : i32
    %2 = arith.cmpi ne, %1, %c0_i32_0 : i32
    scf.if %2 {
      %cst_9 = arith.constant 0.000000e+00 : f32
      %12 = vector.broadcast %cst_9 : f32 to vector<128x32xf32>
      %c0_10 = arith.constant 0 : index
      %c0_11 = arith.constant 0 : index
      %13 = vector.load %arg10[%c0_10, %c0_11] : memref<128x32xf32, #tpu.memory_space<vmem>>, vector<128x32xf32>
      tpu.vector_store %arg10[%c0_10, %c0_11], %12 {strides = array<i32>} : memref<128x32xf32, #tpu.memory_space<vmem>>, vector<128x32xf32>,
    } else {
    }
    %c0 = arith.constant 0 : index
    %c0_1 = arith.constant 0 : index
    %3 = vector.load %arg10[%c0, %c0_1] : memref<128x32xf32, #tpu.memory_space<vmem>>, vector<128x32xf32>
    %c0_2 = arith.constant 0 : index
    %c0_3 = arith.constant 0 : index
    %4 = vector.load %arg2[%c0_2, %c0_3] : memref<128x128xbf16, #tpu.memory_space<vmem>>, vector<128x128xbf16>
    %c0_4 = arith.constant 0 : index
    %c0_5 = arith.constant 0 : index
    %5 = vector.load %arg3[%c0_4, %c0_5] : memref<128x32xbf16, #tpu.memory_space<vmem>>, vector<128x32xbf16>
    %cst = arith.constant dense<0.000000e+00> : vector<128x32xf32>
    %6 = tpu.matmul %4, %5, %cst {dimension_numbers = #tpu.dot_dimension_numbers<[1], [0], [0], [1], [0, 0, 1, 1], [], []>} : vector<128x128xbf16>, vector<128x32xbf16>, vector<128x32xf32> -> vector<128x32xf32>
    %7 = arith.addf %3, %6 : vector<128x32xf32>
    %c0_6 = arith.constant 0 : index
    %c0_7 = arith.constant 0 : index
    %8 = vector.load %arg10[%c0_6, %c0_7] : memref<128x32xf32, #tpu.memory_space<vmem>>, vector<128x32xf32>
    tpu.vector_store %arg10[%c0_6, %c0_7], %7 {strides = array<i32>} : memref<128x32xf32, #tpu.memory_space<vmem>>, vector<128x32xf32>,
    %c1_i32 = arith.constant 1 : i32
    %9 = arith.cmpi eq, %arg1, %c1_i32 : i32
    %10 = arith.extui %9 : i1 to i32
    %c0_i32_8 = arith.constant 0 : i32
    %11 = arith.cmpi ne, %10, %c0_i32_8 : i32
    scf.if %11 {
      %c0_9 = arith.constant 0 : index
      %c0_10 = arith.constant 0 : index
      %12 = vector.load %arg10[%c0_9, %c0_10] : memref<128x32xf32, #tpu.memory_space<vmem>>, vector<128x32xf32>
      %c0_11 = arith.constant 0 : index
      %c0_12 = arith.constant 0 : index
      %13 = vector.load %arg4[%c0_11, %c0_12] : memref<128x32xf32, #tpu.memory_space<vmem>>, vector<128x32xf32>
      %c0_13 = arith.constant 0 : index
      %c0_14 = arith.constant 0 : index
      %14 = vector.load %arg5[%c0_13, %c0_14] : memref<32x32xf32, #tpu.memory_space<vmem>>, vector<32x32xf32>
      %cst_15 = arith.constant dense<0.000000e+00> : vector<128x32xf32>
      %15 = tpu.matmul %12, %14, %cst_15 {dimension_numbers = #tpu.dot_dimension_numbers<[1], [0], [0], [1], [0, 0, 1, 1], [], []>} : vector<128x32xf32>, vector<32x32xf32>, vector<128x32xf32> -> vector<128x32xf32>
      %c0_16 = arith.constant 0 : index
      %c0_17 = arith.constant 0 : index
      %16 = vector.load %arg6[%c0_16, %c0_17] : memref<1x32xf32, #tpu.memory_space<vmem>>, vector<1x32xf32>
      %17 = vector.broadcast %16 : vector<1x32xf32> to vector<128x32xf32>
      %18 = arith.addf %15, %17 : vector<128x32xf32>
      %cst_18 = arith.constant 0.000000e+00 : f32
      %19 = vector.broadcast %cst_18 : f32 to vector<128x32xf32>
      %20 = arith.cmpf oge, %18, %19 : vector<128x32xf32>
      %cst_19 = arith.constant 0.00999999977 : f32
      %21 = vector.broadcast %cst_19 : f32 to vector<128x32xf32>
      %22 = arith.mulf %21, %18 : vector<128x32xf32>
      %23 = arith.select %20, %18, %22 : vector<128x32xi1>, vector<128x32xf32>
      %24 = arith.mulf %13, %12 : vector<128x32xf32>
      %c0_20 = arith.constant 0 : index
      %c0_21 = arith.constant 0 : index
      %25 = vector.load %arg7[%c0_20, %c0_21] : memref<32x32xf32, #tpu.memory_space<vmem>>, vector<32x32xf32>
      %cst_22 = arith.constant dense<0.000000e+00> : vector<128x32xf32>
      %26 = tpu.matmul %24, %25, %cst_22 {dimension_numbers = #tpu.dot_dimension_numbers<[1], [0], [0], [1], [0, 0, 1, 1], [], []>} : vector<128x32xf32>, vector<32x32xf32>, vector<128x32xf32> -> vector<128x32xf32>
      %c0_23 = arith.constant 0 : index
      %c0_24 = arith.constant 0 : index
      %27 = vector.load %arg8[%c0_23, %c0_24] : memref<1x32xf32, #tpu.memory_space<vmem>>, vector<1x32xf32>
      %28 = vector.broadcast %27 : vector<1x32xf32> to vector<128x32xf32>
      %29 = arith.addf %26, %28 : vector<128x32xf32>
      %cst_25 = arith.constant 0.000000e+00 : f32
      %30 = vector.broadcast %cst_25 : f32 to vector<128x32xf32>
      %31 = arith.cmpf oge, %29, %30 : vector<128x32xf32>
      %cst_26 = arith.constant 0.00999999977 : f32
      %32 = vector.broadcast %cst_26 : f32 to vector<128x32xf32>
      %33 = arith.mulf %32, %29 : vector<128x32xf32>
      %34 = arith.select %31, %29, %33 : vector<128x32xi1>, vector<128x32xf32>
      %35 = arith.addf %23, %34 : vector<128x32xf32>
      %36 = arith.mulf %35, %35 : vector<128x32xf32>
      %cst_27 = arith.constant dense<0.000000e+00> : vector<128xf32>
      %37 = vector.multi_reduction <add>, %36, %cst_27 [1] : vector<128x32xf32> to vector<128xf32>
      %38 = vector.shape_cast %37 : vector<128xf32> to vector<128x1xf32>
      %cst_28 = arith.constant 1.000000e-24 : f32
      %39 = vector.broadcast %cst_28 : f32 to vector<128x1xf32>
      %40 = arith.maximumf %38, %39 : vector<128x1xf32>
      %41 = math.rsqrt %40 : vector<128x1xf32>
      %42 = vector.broadcast %41 : vector<128x1xf32> to vector<128x32xf32>
      %43 = arith.mulf %35, %42 : vector<128x32xf32>
      %44 = tpu.concatenate %13, %43 in 1 : vector<128x32xf32>, vector<128x32xf32> -> vector<128x64xf32>
      %c0_29 = arith.constant 0 : index
      %c0_30 = arith.constant 0 : index
      %45 = vector.load %arg9[%c0_29, %c0_30] : memref<128x64xf32, #tpu.memory_space<vmem>>, vector<128x64xf32>
      tpu.vector_store %arg9[%c0_29, %c0_30], %44 {strides = array<i32>} : memref<128x64xf32, #tpu.memory_space<vmem>>, vector<128x64xf32>,
    } else {
    }
    return
  }
  func.func @transform_0(%arg0: i32, %arg1: i32) -> (i32, i32) {
    %c0_i32 = arith.constant 0 : i32
    return %arg0, %arg1 : i32, i32
  }
  func.func @transform_1(%arg0: i32, %arg1: i32) -> (i32, i32) {
    %c0_i32 = arith.constant 0 : i32
    %c0_i32_0 = arith.constant 0 : i32
    return %arg1, %c0_i32 : i32, i32
  }
  func.func @transform_2(%arg0: i32, %arg1: i32) -> (i32, i32) {
    %c0_i32 = arith.constant 0 : i32
    %c0_i32_0 = arith.constant 0 : i32
    return %arg0, %c0_i32 : i32, i32
  }
  func.func @transform_3(%arg0: i32, %arg1: i32) -> (i32, i32) {
    %c0_i32 = arith.constant 0 : i32
    %c0_i32_0 = arith.constant 0 : i32
    %c0_i32_1 = arith.constant 0 : i32
    return %c0_i32, %c0_i32_0 : i32, i32
  }
  func.func @transform_4(%arg0: i32, %arg1: i32) -> (i32, i32) {
    %c0_i32 = arith.constant 0 : i32
    %c0_i32_0 = arith.constant 0 : i32
    %c0_i32_1 = arith.constant 0 : i32
    return %c0_i32, %c0_i32_0 : i32, i32
  }
  func.func @transform_5(%arg0: i32, %arg1: i32) -> (i32, i32) {
    %c0_i32 = arith.constant 0 : i32
    %c0_i32_0 = arith.constant 0 : i32
    %c0_i32_1 = arith.constant 0 : i32
    return %c0_i32, %c0_i32_0 : i32, i32
  }
  func.func @transform_6(%arg0: i32, %arg1: i32) -> (i32, i32) {
    %c0_i32 = arith.constant 0 : i32
    %c0_i32_0 = arith.constant 0 : i32
    %c0_i32_1 = arith.constant 0 : i32
    return %c0_i32, %c0_i32_0 : i32, i32
  }
  func.func @transform_7(%arg0: i32, %arg1: i32) -> (i32, i32) {
    %c0_i32 = arith.constant 0 : i32
    %c0_i32_0 = arith.constant 0 : i32
    return %arg0, %c0_i32 : i32, i32
  }
}

</mosaic_0001>

<bundles_post_ra>
// kernel: ngcf_gcn_forward.1
= control target key start
LH: loop header
LB: loop body
LE: loop exit
PB: predicated region body
PF: predicated region fallthrough
CT: control target
= control target key end

     0   :  { %s2065_s24 = smov 0   ;;  %s2067_s25 = smov 0   ;;  %s2728_s0 = inlined_call_operand.vmem [shape: bf16[256,256], index: 0, kind: input, shape index: {}]   ;;  %s2729_s1 = inlined_call_operand.vmem [shape: bf16[256,32], index: 1, kind: input, shape index: {}]   ;;  %s2730_s2 = inlined_call_operand.vmem [shape: f32[256,32], index: 2, kind: input, shape index: {}]   ;;  %s2731_s3 = inlined_call_operand.vmem [shape: f32[32,32], index: 3, kind: input, shape index: {}]   ;;  %s2732_s4 = inlined_call_operand.vmem [shape: f32[1,32], index: 4, kind: input, shape index: {}]   ;;  %s2733_s5 = inlined_call_operand.vmem [shape: f32[32,32], index: 5, kind: input, shape index: {}]   ;;  %s2734_s6 = inlined_call_operand.vmem [shape: f32[1,32], index: 6, kind: input, shape index: {}]   ;;  %s2735_s7 = inlined_call_operand.vmem [shape: f32[256,64], index: 7, kind: output, shape index: {}]  }
   0x1   :  { %s2069_s26 = smov 0   ;;  %s2071_s27 = smov 0  }
   0x2   :  { %s2073_s28 = smov 0   ;;  %s2075_s29 = smov 0  }
   0x3   :  { %s2077_s30 = smov 0  }
   0x4 LB: > { %s26_s8 = sadd.s32 1, %s2013_s28  ;;  %s29_s9 = sadd.s32 1, %s2017_s29  ;;  %s2021_s30 = sphi %s2077_s30, %s17_s30   ;;  %s2017_s29 = sphi %s2075_s29, %s2744_s29   ;;  %s2013_s28 = sphi %s2073_s28, %s2743_s28   ;;  %s2009_s27 = sphi %s2071_s27, %s2742_s27   ;;  %s2005_s26 = sphi %s2069_s26, %s2741_s26   ;;  %s2001_s25 = sphi %s2067_s25, %s2740_s25   ;;  %s1997_s24 = sphi %s2065_s24, %s2739_s24  }
   0x5   : > { %p27_p0 = scmp.ge.s32.totalorder %s26_s8, 2  ;;  %p45_p1 = scmp.ne.s32.totalorder %s2001_s25, %s1997_s24 }
   0x6   : > { %p46_p2 = scmp.eq.s32.totalorder %s2021_s30, 0  ;;  %s38_s13 = sadd.s32 1, %s2001_s25 }
   0x7   : > { %s2746_s8 = smov (%p27_p0, %s26_s8), 0  ;;  %s2748_s9 = smov (!%p27_p0, %s29_s9), %s2017_s29 }
   0x8   : > { %p47_p3 = por %p46_p2, %p45_p1  ;;  %p31_p4 = scmp.ge.s32.totalorder %s2748_s9, 2 }
   0x9   : > { %s34_s10 = ssub.s32 %s2013_s28, %s2746_s8  ;;  %p1625_p6 = scmp.ge.s32.totalorder %s2021_s30, 4 }
   0xa   : > { %s2750_s9 = smov (%p31_p4, %s2748_s9), 0 }
   0xb   : > { %s33_s11 = ssub.s32 %s2017_s29, %s2750_s9  ;;  %245 = sbr.rel (%p1625_p6) target bundleno = 32 (0x20), region = 32 }
   0xc   : > { %s35_s12 = sor.u32 %s34_s10, %s33_s11 }
   0xd   : > { %p36_p5 = scmp.eq.s32.totalorder %s35_s12, 0 }
   0xf   : > { %s2116_s14 = scalar_select %p36_p5, %s2001_s25, %s38_s13  }
  0x10   : > { %248 = sbr.rel (!%p47_p3) target bundleno = 32 (0x20), region = 36  ;;  %s250_s15 = sand.u32 (%p47_p3), 1, %s2001_s25  }
  0x11   : > { %s1692_s16 = sshll.u32 (%p47_p3), %s2017_s29, 5  ;;  %s1626_s17 = sshll.u32 (%p47_p3), %s250_s15, 6 }
  0x12   : > { %s255_s18 = sadd.s32 (%p47_p3), %s2013_s28, %s1692_s16  ;;  %s252_s23 = scalar_lea.vmem (%p47_p3), [#allocation3], %s1626_s17 }
  0x13   : > { %s1629_s19 = sshll.u32 (%p47_p3), %s255_s18, 2 }
  0x14   : > { %s2125_s22 = scalar_lea.vmem (%p47_p3), %s2728_s0, %s1629_s19 }
  0x15   : > { %v274_v0 = vld [vmem:[%s2125_s22] sm:$0xf]  ;;  %v276_v1 = vld [vmem:[%s2125_s22 + $0x8] sm:$0xf]  ;;  %v278_v2 = vld [vmem:[%s2125_s22 + $0x10] sm:$0xf] }
  0x16   : > { %275 = vst [vmem:[%s252_s23] sm:$0xf] %v274_v0  ;;  %277 = vst [vmem:[%s252_s23 + $0x4] sm:$0xf] %v276_v1  ;;  %v280_v3 = vld [vmem:[%s2125_s22 + $0x18] sm:$0xf] }
  0x17   : > { %279 = vst [vmem:[%s252_s23 + $0x8] sm:$0xf] %v278_v2  ;;  %v282_v4 = vld [vmem:[%s2125_s22 + $0x20] sm:$0xf]  ;;  %v284_v5 = vld [vmem:[%s2125_s22 + $0x28] sm:$0xf] }
  0x18   : > { %281 = vst [vmem:[%s252_s23 + $0xc] sm:$0xf] %v280_v3  ;;  %283 = vst [vmem:[%s252_s23 + $0x10] sm:$0xf] %v282_v4  ;;  %v286_v6 = vld [vmem:[%s2125_s22 + $0x30] sm:$0xf] }
  0x19   : > { %285 = vst [vmem:[%s252_s23 + $0x14] sm:$0xf] %v284_v5  ;;  %v288_v7 = vld [vmem:[%s2125_s22 + $0x38] sm:$0xf]  ;;  %v290_v8 = vld [vmem:[%s2125_s22 + $0x40] sm:$0xf] }
  0x1a   : > { %287 = vst [vmem:[%s252_s23 + $0x18] sm:$0xf] %v286_v6  ;;  %289 = vst [vmem:[%s252_s23 + $0x1c] sm:$0xf] %v288_v7  ;;  %v292_v9 = vld [vmem:[%s2125_s22 + $0x48] sm:$0xf] }
  0x1b   : > { %291 = vst [vmem:[%s252_s23 + $0x20] sm:$0xf] %v290_v8  ;;  %v294_v10 = vld [vmem:[%s2125_s22 + $0x50] sm:$0xf]  ;;  %v296_v11 = vld [vmem:[%s2125_s22 + $0x58] sm:$0xf] }
  0x1c   : > { %293 = vst [vmem:[%s252_s23 + $0x24] sm:$0xf] %v292_v9  ;;  %295 = vst [vmem:[%s252_s23 + $0x28] sm:$0xf] %v294_v10  ;;  %v298_v12 = vld [vmem:[%s2125_s22 + $0x60] sm:$0xf] }
  0x1d   : > { %297 = vst [vmem:[%s252_s23 + $0x2c] sm:$0xf] %v296_v11  ;;  %v300_v13 = vld [vmem:[%s2125_s22 + $0x68] sm:$0xf]  ;;  %v302_v14 = vld [vmem:[%s2125_s22 + $0x70] sm:$0xf] }
  0x1e   : > { %299 = vst [vmem:[%s252_s23 + $0x30] sm:$0xf] %v298_v12  ;;  %301 = vst [vmem:[%s252_s23 + $0x34] sm:$0xf] %v300_v13  ;;  %v304_v15 = vld [vmem:[%s2125_s22 + $0x78] sm:$0xf] }
  0x1f   : > { %303 = vst [vmem:[%s252_s23 + $0x38] sm:$0xf] %v302_v14  ;;  %305 = vst [vmem:[%s252_s23 + $0x3c] sm:$0xf] %v304_v15 }
  0x20 PF: > { %p1630_p7 = scmp.ge.s32.totalorder %s2021_s30, 1  ;;  %p378_p8 = scmp.lt.s32.totalorder %s2021_s30, 5 }
  0x22   : > { %p379_p9 = pnand %p1630_p7, %p378_p8 }
  0x23   : > { %s385_s10 = sand.u32 (!%p379_p9), 1, %s1997_s24   ;;  %s1632_s11 = sshll.u32 (!%p379_p9), %s2005_s26, 4 }
  0x24   : > { %382 = sbr.rel (%p379_p9) target bundleno = 832 (0x340), region = 85  ;;  %s1631_s12 = sshll.u32 (!%p379_p9), %s385_s10, 6 }
  0x25   : > { %p428_p10 = scmp.lt.s32.totalorder (!%p379_p9), %s1632_s11, 31  ;;  %s1634_s13 = sshll.u32 (!%p379_p9), %s2009_s27, 4 }
  0x26   : > { %p434_p11 = scmp.lt.s32.totalorder (!%p379_p9), %s1634_s13, 31  ;;  %s2163_s27 = scalar_lea.vmem (!%p379_p9), [#allocation3], %s1631_s12 }
  0x27   : > { %p1638_p12 = scmp.ne.s32.totalorder (!%p379_p9), %s2005_s26, 0 }
  0x29   : > { %s2752_s11 = smov (!%p428_p10, %s1632_s11), 31  ;;  %s2754_s13 = smov (!%p434_p11, %s1634_s13), 31 }
  0x2a   : > { %s1633_s15 = sshll.u32 %s2752_s11, 2  ;;  %s1635_s19 = sshll.u32 %s2754_s13, 3 }
  0x2b   : > { %s2151_s18 = scalar_lea.vmem %s2729_s1, %s1633_s15  ;;  %s2156_s22 = scalar_lea.vmem %s2730_s2, %s1635_s19 }
  0x2c   : > { %s2161_s10 = scalar_lea.vmem %s2735_s7, %s1635_s19  ;;  %449 = sbr.rel (%p1638_p12) target bundleno = 58 (0x3a), region = 93 }
  0x31   : > { %vm450_vm0 = vcmask 261120   ;;  %v2023_v16 = vmov 0.0  }
  0x32   : > { %451 = vst.msk [vmem:[#allocation2] sm:$0xff] %vm450_vm0, %v2023_v16  ;;  %452 = vst.msk [vmem:[#allocation2 + $0x8] sm:$0xff] %vm450_vm0, %v2023_v16 }
  0x33   : > { %453 = vst.msk [vmem:[#allocation2 + $0x10] sm:$0xff] %vm450_vm0, %v2023_v16  ;;  %454 = vst.msk [vmem:[#allocation2 + $0x18] sm:$0xff] %vm450_vm0, %v2023_v16 }
  0x34   : > { %455 = vst.msk [vmem:[#allocation2 + $0x20] sm:$0xff] %vm450_vm0, %v2023_v16  ;;  %456 = vst.msk [vmem:[#allocation2 + $0x28] sm:$0xff] %vm450_vm0, %v2023_v16 }
  0x35   : > { %457 = vst.msk [vmem:[#allocation2 + $0x30] sm:$0xff] %vm450_vm0, %v2023_v16  ;;  %458 = vst.msk [vmem:[#allocation2 + $0x38] sm:$0xff] %vm450_vm0, %v2023_v16 }
  0x36   : > { %459 = vst.msk [vmem:[#allocation2 + $0x40] sm:$0xff] %vm450_vm0, %v2023_v16  ;;  %460 = vst.msk [vmem:[#allocation2 + $0x48] sm:$0xff] %vm450_vm0, %v2023_v16 }
  0x37   : > { %461 = vst.msk [vmem:[#allocation2 + $0x50] sm:$0xff] %vm450_vm0, %v2023_v16  ;;  %462 = vst.msk [vmem:[#allocation2 + $0x58] sm:$0xff] %vm450_vm0, %v2023_v16 }
  0x38   : > { %463 = vst.msk [vmem:[#allocation2 + $0x60] sm:$0xff] %vm450_vm0, %v2023_v16  ;;  %464 = vst.msk [vmem:[#allocation2 + $0x68] sm:$0xff] %vm450_vm0, %v2023_v16 }
  0x39   : > { %465 = vst.msk [vmem:[#allocation2 + $0x70] sm:$0xff] %vm450_vm0, %v2023_v16  ;;  %466 = vst.msk [vmem:[#allocation2 + $0x78] sm:$0xff] %vm450_vm0, %v2023_v16 }
  0x3a PF: > { %v1919_v17 = vld [vmem:[%s2151_s18 + $0x38] sm:$0xff]   ;;  %v1920_v18 = vld [vmem:[%s2151_s18 + $0x30] sm:$0xff]   ;;  %v1921_v19 = vld [vmem:[%s2151_s18 + $0x28] sm:$0xff]   ;;  %vm724_vm1 = vcmask 261120   ;;  %p1655_p13 = scmp.ne.s32.totalorder %s2005_s26, 1 }
  0x3b   : > { %1749 = vmatprep.subr.bf16.mxu0 %v1919_v17  ;;  %1845 = vmatprep.subr.bf16.mxu1 %v1919_v17  ;;  %v1922_v20 = vld [vmem:[%s2151_s18 + $0x20] sm:$0xff]   ;;  %v1923_v23 = vld [vmem:[%s2151_s18 + $0x18] sm:$0xff]   ;;  %v1924_v24 = vld [vmem:[%s2151_s18 + $0x10] sm:$0xff]  }
  0x3c   : > { %1750 = vmatpush3.bf16.msra.mxu0 %v1919_v17  ;;  %1853 = vmatpush3.bf16.msra.mxu1 %v1919_v17  ;;  %v1927_v21 = vld [vmem:[%s2163_s27] sm:$0xff]   ;;  %v1925_v25 = vld [vmem:[%s2151_s18 + $0x8] sm:$0xff]   ;;  %v1931_v29 = vld [vmem:[%s2163_s27 + $0x10] sm:$0xff]  }
  0x3d   : > { %1751 = vmatprep.subr.bf16.mxu0 %v1920_v18  ;;  %1846 = vmatprep.subr.bf16.mxu1 %v1920_v18  ;;  %v1928_v22 = vld [vmem:[%s2163_s27 + $0x20] sm:$0xff]   ;;  %v1929_v27 = vld [vmem:[%s2163_s27 + $0x8] sm:$0xff]   ;;  %v1932_v30 = vld [vmem:[%s2163_s27 + $0x30] sm:$0xff]  }
  0x3e   : > { %1765 = vmatprep.mubr.bf16.mxu0 %v1927_v21  ;;  %1773 = vmatprep.mubr.bf16.mxu1 %v1928_v22  ;;  %v1926_v26 = vld [vmem:[%s2151_s18] sm:$0xff]   ;;  %v1930_v28 = vld [vmem:[%s2163_s27 + $0x28] sm:$0xff]   ;;  %v1933_v31 = vld [vmem:[%s2163_s27 + $0x18] sm:$0xff]  }
  0x3f   : > { %v1934_v32 = vld [vmem:[%s2163_s27 + $0x38] sm:$0xff]   ;;  %v469_v33 = vld [vmem:[#allocation2 + $0x10] sm:$0xff]  ;;  %v467_v37 = vld [vmem:[#allocation2] sm:$0xff] }
  0x40   : > { %1752 = vmatpush3.bf16.msra.mxu0 %v1920_v18  ;;  %1854 = vmatpush3.bf16.msra.mxu1 %v1920_v18  ;;  %v477_v34 = vld [vmem:[#allocation2 + $0x50] sm:$0xff]  ;;  %v475_v38 = vld [vmem:[#allocation2 + $0x40] sm:$0xff]  ;;  %v470_v43 = vld [vmem:[#allocation2 + $0x18] sm:$0xff] }
  0x41   : > { %1753 = vmatprep.subr.bf16.mxu0 %v1921_v19  ;;  %1847 = vmatprep.subr.bf16.mxu1 %v1921_v19  ;;  %v478_v44 = vld [vmem:[#allocation2 + $0x58] sm:$0xff]  ;;  %v468_v49 = vld [vmem:[#allocation2 + $0x8] sm:$0xff]  ;;  %v473_v55 = vld [vmem:[#allocation2 + $0x30] sm:$0xff] }
  0x42   : > { %v476_v50 = vld [vmem:[#allocation2 + $0x48] sm:$0xff]  ;;  %v481_v56 = vld [vmem:[#allocation2 + $0x70] sm:$0xff]  ;;  %v471_v61 = vld [vmem:[#allocation2 + $0x20] sm:$0xff] }
  0x43   : > { %v479_v62 = vld [vmem:[#allocation2 + $0x60] sm:$0xff]  ;;  %v474_v3 = vld [vmem:[#allocation2 + $0x38] sm:$0xff]  ;;  %v472_v9 = vld [vmem:[#allocation2 + $0x28] sm:$0xff] }
  0x44   : > { %1754 = vmatpush3.bf16.msra.mxu0 %v1921_v19  ;;  %1855 = vmatpush3.bf16.msra.mxu1 %v1921_v19  ;;  %v482_v4 = vld [vmem:[#allocation2 + $0x78] sm:$0xff]  ;;  %v480_v10 = vld [vmem:[#allocation2 + $0x68] sm:$0xff] }
  0x45   : > { %1755 = vmatprep.subr.bf16.mxu0 %v1922_v20  ;;  %1848 = vmatprep.subr.bf16.mxu1 %v1922_v20 }
  0x48   : > { %1756 = vmatpush3.bf16.msra.mxu0 %v1922_v20  ;;  %1856 = vmatpush3.bf16.msra.mxu1 %v1922_v20 }
  0x49   : > { %1757 = vmatprep.subr.bf16.mxu0 %v1923_v23  ;;  %1849 = vmatprep.subr.bf16.mxu1 %v1923_v23 }
  0x4c   : > { %1758 = vmatpush3.bf16.msra.mxu0 %v1923_v23  ;;  %1857 = vmatpush3.bf16.msra.mxu1 %v1923_v23 }
  0x4d   : > { %1759 = vmatprep.subr.bf16.mxu0 %v1924_v24  ;;  %1850 = vmatprep.subr.bf16.mxu1 %v1924_v24 }
  0x50   : > { %1760 = vmatpush3.bf16.msra.mxu0 %v1924_v24  ;;  %1858 = vmatpush3.bf16.msra.mxu1 %v1924_v24 }
  0x51   : > { %1761 = vmatprep.subr.bf16.mxu0 %v1925_v25  ;;  %1851 = vmatprep.subr.bf16.mxu1 %v1925_v25 }
  0x54   : > { %1762 = vmatpush3.bf16.msra.mxu0 %v1925_v25  ;;  %1859 = vmatpush3.bf16.msra.mxu1 %v1925_v25 }
  0x55   : > { %1763 = vmatprep.subr.bf16.mxu0 %v1926_v26  ;;  %1852 = vmatprep.subr.bf16.mxu1 %v1926_v26 }
  0x58   : > { %1764 = vmatpush3.bf16.msra.mxu0 %v1926_v26  ;;  %1860 = vmatpush3.bf16.msra.mxu1 %v1926_v26 }
  0x5b   : > { %1766 = vmatmul.mubr.bf16.vlgmr.msra.gmra.mxu0 %v1929_v27  ;;  %1774 = vmatmul.mubr.bf16.vlgmr.msra.gmra.mxu1 %v1930_v28 }
  0x5c   : > { %1769 = vmatprep.mubr.bf16.mxu0 %v1931_v29  ;;  %1777 = vmatprep.mubr.bf16.mxu1 %v1932_v30 }
  0x63   : > { %1770 = vmatmul.mubr.bf16.gmra.mxu0 %v1933_v31  ;;  %1778 = vmatmul.mubr.bf16.gmra.mxu1 %v1934_v32 }
 0x11b   : > { %v1767_v35 = vpop.f32.mrf.mxu0  ;;  %v1775_v36 = vpop.f32.mrf.mxu1 }
 0x11c   : > { %v710_v39 = vadd.f32 %v1767_v35, %v469_v33  ;;  %v718_v40 = vadd.f32 %v1775_v36, %v477_v34 }
 0x11d   : > { %v645_v41 = vpop.f32.mrf.mxu0  ;;  %v677_v42 = vpop.f32.mrf.mxu1 }
 0x11e   : > { %727 = vst.msk [vmem:[#allocation2 + $0x10] sm:$0xff] %vm724_vm1, %v710_v39  ;;  %735 = vst.msk [vmem:[#allocation2 + $0x50] sm:$0xff] %vm724_vm1, %v718_v40  ;;  %v708_v45 = vadd.f32 %v645_v41, %v467_v37  ;;  %v716_v46 = vadd.f32 %v677_v42, %v475_v38 }
 0x11f   : > { %v1768_v47 = vpop.f32.mrf.mxu0  ;;  %v1776_v48 = vpop.f32.mrf.mxu1 }
 0x120   : > { %725 = vst.msk [vmem:[#allocation2] sm:$0xff] %vm724_vm1, %v708_v45  ;;  %733 = vst.msk [vmem:[#allocation2 + $0x40] sm:$0xff] %vm724_vm1, %v716_v46  ;;  %v711_v51 = vadd.f32 %v1768_v47, %v470_v43  ;;  %v719_v52 = vadd.f32 %v1776_v48, %v478_v44 }
 0x121   : > { %v648_v53 = vpop.f32.mrf.mxu0  ;;  %v680_v54 = vpop.f32.mrf.mxu1 }
 0x122   : > { %728 = vst.msk [vmem:[#allocation2 + $0x18] sm:$0xff] %vm724_vm1, %v711_v51  ;;  %736 = vst.msk [vmem:[#allocation2 + $0x58] sm:$0xff] %vm724_vm1, %v719_v52  ;;  %v709_v57 = vadd.f32 %v648_v53, %v468_v49  ;;  %v717_v58 = vadd.f32 %v680_v54, %v476_v50 }
 0x123   : > { %v1771_v59 = vpop.f32.mrf.mxu0  ;;  %v1779_v60 = vpop.f32.mrf.mxu1 }
 0x124   : > { %726 = vst.msk [vmem:[#allocation2 + $0x8] sm:$0xff] %vm724_vm1, %v709_v57  ;;  %734 = vst.msk [vmem:[#allocation2 + $0x48] sm:$0xff] %vm724_vm1, %v717_v58  ;;  %v714_v63 = vadd.f32 %v1771_v59, %v473_v55  ;;  %v722_v0 = vadd.f32 %v1779_v60, %v481_v56 }
 0x125   : > { %v661_v1 = vpop.f32.mrf.mxu0  ;;  %v693_v2 = vpop.f32.mrf.mxu1 }
 0x126   : > { %731 = vst.msk [vmem:[#allocation2 + $0x30] sm:$0xff] %vm724_vm1, %v714_v63  ;;  %739 = vst.msk [vmem:[#allocation2 + $0x70] sm:$0xff] %vm724_vm1, %v722_v0  ;;  %v712_v5 = vadd.f32 %v661_v1, %v471_v61  ;;  %v720_v6 = vadd.f32 %v693_v2, %v479_v62 }
 0x127   : > { %v1772_v7 = vpop.f32.mrf.mxu0  ;;  %v1780_v8 = vpop.f32.mrf.mxu1 }
 0x128   : > { %729 = vst.msk [vmem:[#allocation2 + $0x20] sm:$0xff] %vm724_vm1, %v712_v5  ;;  %737 = vst.msk [vmem:[#allocation2 + $0x60] sm:$0xff] %vm724_vm1, %v720_v6  ;;  %v715_v11 = vadd.f32 %v1772_v7, %v474_v3  ;;  %v723_v12 = vadd.f32 %v1780_v8, %v482_v4  ;;  %744 = sbr.rel (%p1655_p13) target bundleno = 832 (0x340), region = 97 }
 0x129   : > { %v664_v13 = vpop.f32.mrf.mxu0  ;;  %v696_v14 = vpop.f32.mrf.mxu1 }
 0x12a   : > { %732 = vst.msk [vmem:[#allocation2 + $0x38] sm:$0xff] %vm724_vm1, %v715_v11  ;;  %740 = vst.msk [vmem:[#allocation2 + $0x78] sm:$0xff] %vm724_vm1, %v723_v12  ;;  %v713_v15 = vadd.f32 %v664_v13, %v472_v9  ;;  %v721_v16 = vadd.f32 %v696_v14, %v480_v10 }
 0x12c   : > { %730 = vst.msk [vmem:[#allocation2 + $0x28] sm:$0xff] %vm724_vm1, %v713_v15  ;;  %738 = vst.msk [vmem:[#allocation2 + $0x68] sm:$0xff] %vm724_vm1, %v721_v16 }
 0x12d   : > { %v780_v17 = vld [vmem:[%s2731_s3 + $0x18] sm:$0xff]  ;;  %v779_v19 = vld [vmem:[%s2731_s3 + $0x10] sm:$0xff]  ;;  %v778_v21 = vld [vmem:[%s2731_s3 + $0x8] sm:$0xff]  ;;  %s2024_s17 = smov 32  }
 0x12e   : > { %v1048_v18 = vld [vmem:[%s2733_s5 + $0x18] sm:$0xff]  ;;  %1781 = vmatprep.subr.mxu0 %v780_v17  ;;  %v1047_v20 = vld [vmem:[%s2733_s5 + $0x10] sm:$0xff]  ;;  %v1046_v22 = vld [vmem:[%s2733_s5 + $0x8] sm:$0xff] }
 0x12f   : > { %1813 = vmatprep.subr.mxu1 %v1048_v18  ;;  %1782 = vmatpush3.msra.mxu0 %v780_v17  ;;  %v777_v23 = vld [vmem:[%s2731_s3] sm:$0xff]  ;;  %v746_v26 = vld [vmem:[#allocation2 + $0x8] sm:$0xff]  ;;  %v747_v29 = vld [vmem:[#allocation2 + $0x10] sm:$0xff] }
 0x130   : > { %1814 = vmatpush3.msra.mxu1 %v1048_v18  ;;  %v745_v24 = vld [vmem:[#allocation2] sm:$0xff]  ;;  %1783 = vmatprep.subr.mxu0 %v779_v19  ;;  %v2240_v27 = vld [vmem:[%s2156_s22 + $0x8] sm:$0xff]  ;;  %v2246_v30 = vld [vmem:[%s2156_s22 + $0x10] sm:$0xff] }
 0x131   : > { %1815 = vmatprep.subr.mxu1 %v1047_v20  ;;  %v2237_v25 = vld [vmem:[%s2156_s22] sm:$0xff]  ;;  %1784 = vmatpush3.msra.mxu0 %v779_v19  ;;  %v1030_v32 = vmul.f32 %v2240_v27, %v746_v26  ;;  %v1031_v33 = vmul.f32 %v2246_v30, %v747_v29  ;;  %v748_v34 = vld [vmem:[#allocation2 + $0x18] sm:$0xff]  ;;  %v2266_v41 = vld [vmem:[%s2156_s22 + $0x28] sm:$0xff] }
 0x132   : > { %1816 = vmatpush3.msra.mxu1 %v1047_v20  ;;  %v1045_v28 = vld [vmem:[%s2733_s5] sm:$0xff]  ;;  %1785 = vmatprep.subr.mxu0 %v778_v21  ;;  %v1029_v31 = vmul.f32 %v2237_v25, %v745_v24  ;;  %v2252_v35 = vld [vmem:[%s2156_s22 + $0x18] sm:$0xff]  ;;  %v751_v42 = vld [vmem:[#allocation2 + $0x30] sm:$0xff] }
 0x133   : > { %1817 = vmatprep.subr.mxu1 %v1046_v22  ;;  %1786 = vmatpush3.msra.mxu0 %v778_v21  ;;  %v749_v36 = vld [vmem:[#allocation2 + $0x20] sm:$0xff]  ;;  %v1032_v38 = vmul.f32 %v2252_v35, %v748_v34  ;;  %v750_v40 = vld [vmem:[#allocation2 + $0x28] sm:$0xff]  ;;  %v2269_v43 = vld [vmem:[%s2156_s22 + $0x30] sm:$0xff] }
 0x134   : > { %1818 = vmatpush3.msra.mxu1 %v1046_v22  ;;  %1787 = vmatprep.subr.mxu0 %v777_v23  ;;  %v2256_v37 = vld [vmem:[%s2156_s22 + $0x20] sm:$0xff]  ;;  %v1034_v44 = vmul.f32 %v2266_v41, %v750_v40  ;;  %v1035_v45 = vmul.f32 %v2269_v43, %v751_v42  ;;  %v752_v46 = vld [vmem:[#allocation2 + $0x38] sm:$0xff]  ;;  %v754_v52 = vld [vmem:[#allocation2 + $0x48] sm:$0xff] }
 0x135   : > { %1819 = vmatprep.subr.mxu1 %v1045_v28  ;;  %1788 = vmatpush3.msra.mxu0 %v777_v23  ;;  %v1033_v39 = vmul.f32 %v2256_v37, %v749_v36  ;;  %v2278_v47 = vld [vmem:[%s2156_s22 + $0x38] sm:$0xff]  ;;  %v753_v48 = vld [vmem:[#allocation2 + $0x40] sm:$0xff]  ;;  %v2290_v53 = vld [vmem:[%s2156_s22 + $0x48] sm:$0xff] }
 0x136   : > { %1789 = vmatprep.mubr.msk.f32.mxu0 %vm724_vm1, %v745_v24  ;;  %1820 = vmatpush3.msra.mxu1 %v1045_v28  ;;  %v2281_v49 = vld [vmem:[%s2156_s22 + $0x40] sm:$0xff]  ;;  %v1036_v50 = vmul.f32 %v2278_v47, %v752_v46  ;;  %v755_v54 = vld [vmem:[#allocation2 + $0x50] sm:$0xff]  ;;  %v1038_v56 = vmul.f32 %v2290_v53, %v754_v52  ;;  %v756_v58 = vld [vmem:[#allocation2 + $0x58] sm:$0xff] }
 0x137   : > { %1821 = vmatprep.mubr.msk.f32.mxu1 %vm724_vm1, %v1029_v31  ;;  %1790 = vmatmul.mubr.msk.f32.vlgmr.msra.gmra.mxu0 %vm724_vm1, %v746_v26  ;;  %v1037_v51 = vmul.f32 %v2281_v49, %v753_v48  ;;  %v2293_v55 = vld [vmem:[%s2156_s22 + $0x50] sm:$0xff]  ;;  %v2302_v59 = vld [vmem:[%s2156_s22 + $0x58] sm:$0xff]  ;;  %v757_v60 = vld [vmem:[#allocation2 + $0x60] sm:$0xff] }
 0x138   : > { %1822 = vmatmul.mubr.msk.f32.vlgmr.msra.gmra.mxu1 %vm724_vm1, %v1030_v32  ;;  %1792 = vmatprep.mubr.msk.f32.mxu0 %vm724_vm1, %v747_v29  ;;  %v1039_v57 = vmul.f32 %v2293_v55, %v755_v54  ;;  %v2305_v61 = vld [vmem:[%s2156_s22 + $0x60] sm:$0xff]  ;;  %v1040_v62 = vmul.f32 %v2302_v59, %v756_v58  ;;  %v758_v0 = vld [vmem:[#allocation2 + $0x68] sm:$0xff]  ;;  %v759_v2 = vld [vmem:[#allocation2 + $0x70] sm:$0xff] }
 0x139   : > { %1824 = vmatprep.mubr.msk.f32.mxu1 %vm724_vm1, %v1031_v33  ;;  %v1041_v63 = vmul.f32 %v2305_v61, %v757_v60  ;;  %v2314_v1 = vld [vmem:[%s2156_s22 + $0x68] sm:$0xff]  ;;  %v2317_v3 = vld [vmem:[%s2156_s22 + $0x70] sm:$0xff]  ;;  %v760_v6 = vld [vmem:[#allocation2 + $0x78] sm:$0xff] }
 0x13a   : > { %v1042_v4 = vmul.f32 %v2314_v1, %v758_v0  ;;  %v1043_v5 = vmul.f32 %v2317_v3, %v759_v2  ;;  %v2326_v7 = vld [vmem:[%s2156_s22 + $0x78] sm:$0xff]  ;;  %v2338_v9 = vld [vmem:[%s2732_s4] ss:$0 sm:$0xff] }
 0x13b   : > { %1793 = vmatmul.mubr.msk.f32.gmra.mxu0 %vm724_vm1, %v748_v34  ;;  %2737 = vst [vmem:[#allocation4_spill] sm:$0xff] %v2326_v7  ;;  %v1044_v8 = vmul.f32 %v2326_v7, %v760_v6  ;;  %v2343_v10 = vld [vmem:[%s2734_s6] ss:$0 sm:$0xff] }
 0x13c   : > { %1825 = vmatmul.mubr.msk.f32.gmra.mxu1 %vm724_vm1, %v1032_v38  ;;  %1795 = vmatprep.mubr.msk.f32.mxu0 %vm724_vm1, %v749_v36 }
 0x13d   : > { %1827 = vmatprep.mubr.msk.f32.mxu1 %vm724_vm1, %v1033_v39 }
 0x13f   : > { %1796 = vmatmul.mubr.msk.f32.gmra.mxu0 %vm724_vm1, %v750_v40 }
 0x140   : > { %1828 = vmatmul.mubr.msk.f32.gmra.mxu1 %vm724_vm1, %v1034_v44  ;;  %1798 = vmatprep.mubr.msk.f32.mxu0 %vm724_vm1, %v751_v42 }
 0x141   : > { %1830 = vmatprep.mubr.msk.f32.mxu1 %vm724_vm1, %v1035_v45 }
 0x143   : > { %1799 = vmatmul.mubr.msk.f32.gmra.mxu0 %vm724_vm1, %v752_v46 }
 0x144   : > { %1831 = vmatmul.mubr.msk.f32.gmra.mxu1 %vm724_vm1, %v1036_v50  ;;  %1801 = vmatprep.mubr.msk.f32.mxu0 %vm724_vm1, %v753_v48 }
 0x145   : > { %1833 = vmatprep.mubr.msk.f32.mxu1 %vm724_vm1, %v1037_v51 }
 0x147   : > { %1802 = vmatmul.mubr.msk.f32.gmra.mxu0 %vm724_vm1, %v754_v52 }
 0x148   : > { %1834 = vmatmul.mubr.msk.f32.gmra.mxu1 %vm724_vm1, %v1038_v56  ;;  %1804 = vmatprep.mubr.msk.f32.mxu0 %vm724_vm1, %v755_v54 }
 0x149   : > { %1836 = vmatprep.mubr.msk.f32.mxu1 %vm724_vm1, %v1039_v57 }
 0x14b   : > { %1805 = vmatmul.mubr.msk.f32.gmra.mxu0 %vm724_vm1, %v756_v58 }
 0x14c   : > { %1837 = vmatmul.mubr.msk.f32.gmra.mxu1 %vm724_vm1, %v1040_v62  ;;  %1807 = vmatprep.mubr.msk.f32.mxu0 %vm724_vm1, %v757_v60 }
 0x14d   : > { %1839 = vmatprep.mubr.msk.f32.mxu1 %vm724_vm1, %v1041_v63 }
 0x14f   : > { %1808 = vmatmul.mubr.msk.f32.gmra.mxu0 %vm724_vm1, %v758_v0 }
 0x150   : > { %1840 = vmatmul.mubr.msk.f32.gmra.mxu1 %vm724_vm1, %v1042_v4  ;;  %1810 = vmatprep.mubr.msk.f32.mxu0 %vm724_vm1, %v759_v2 }
 0x151   : > { %1842 = vmatprep.mubr.msk.f32.mxu1 %vm724_vm1, %v1043_v5 }
 0x153   : > { %1811 = vmatmul.mubr.msk.f32.gmra.mxu0 %vm724_vm1, %v760_v6 }
 0x154   : > { %1843 = vmatmul.mubr.msk.f32.gmra.mxu1 %vm724_vm1, %v1044_v8 }
 0x1f7   : > { %v1791_v11 = vpop.f32.mrf.mxu0 }
 0x1f8   : > { %v1823_v12 = vpop.f32.mrf.mxu1  ;;  %v908_v13 = vadd.f32 %v1791_v11, %v2338_v9 }
 0x1f9   : > { %v1176_v14 = vadd.f32 %v1823_v12, %v2343_v10  ;;  %v902_v15 = vpop.f32.mrf.mxu0 }
 0x1fa   : > { %v1170_v16 = vpop.f32.mrf.mxu1  ;;  %vm982_vm2 = vcmp.ge.f32.partialorder %v908_v13, 0.0  ;;  %v998_v17 = vmul.f32 0.01, %v908_v13  ;;  %v903_v19 = vadd.f32 %v2338_v9, %v902_v15 }
 0x1fb   : > { %vm1250_vm3 = vcmp.ge.f32.partialorder %v1176_v14, 0.0  ;;  %v1266_v18 = vmul.f32 0.01, %v1176_v14  ;;  %v1794_v20 = vpop.f32.mrf.mxu0  ;;  %v1171_v28 = vadd.f32 %v2343_v10, %v1170_v16 }
 0x1fc   : > { %v1826_v21 = vpop.f32.mrf.mxu1  ;;  %v918_v22 = vadd.f32 %v1794_v20, %v2338_v9  ;;  %v1014_v24 = vsel %vm982_vm2, %v908_v13, %v998_v17  ;;  %v997_v40 = vmul.f32 0.01, %v903_v19  ;;  %vm981_vm6 = vcmp.ge.f32.partialorder %v903_v19, 0.0 }
 0x1fd   : > { %v1186_v23 = vadd.f32 %v1826_v21, %v2343_v10  ;;  %v1282_v26 = vsel %vm1250_vm3, %v1176_v14, %v1266_v18  ;;  %v912_v29 = vpop.f32.mrf.mxu0  ;;  %v1265_v46 = vmul.f32 0.01, %v1171_v28  ;;  %vm1249_vm7 = vcmp.ge.f32.partialorder %v1171_v28, 0.0 }
 0x1fe   : > { %v1180_v31 = vpop.f32.mrf.mxu1  ;;  %vm984_vm4 = vcmp.ge.f32.partialorder %v918_v22, 0.0  ;;  %v1000_v32 = vmul.f32 0.01, %v918_v22  ;;  %v913_v34 = vadd.f32 %v2338_v9, %v912_v29  ;;  %v2352_v39 = vadd.f32 %v1282_v26, %v1014_v24 }
 0x1ff   : > { %vm1252_vm5 = vcmp.ge.f32.partialorder %v1186_v23, 0.0  ;;  %v1268_v33 = vmul.f32 0.01, %v1186_v23  ;;  %v1797_v36 = vpop.f32.mrf.mxu0  ;;  %v1181_v42 = vadd.f32 %v2343_v10, %v1180_v31  ;;  %v1013_v0 = vsel %vm981_vm6, %v903_v19, %v997_v40 }
 0x200   : > { %v1829_v38 = vpop.f32.mrf.mxu1  ;;  %v1016_v44 = vsel %vm984_vm4, %v918_v22, %v1000_v32  ;;  %v2356_v48 = vadd.f32 %v1797_v36, %v2338_v9  ;;  %v999_v54 = vmul.f32 0.01, %v913_v34  ;;  %v1314_v57 = vmul.f32 %v2352_v39, %v2352_v39 }
 0x201   : > { %v1284_v45 = vsel %vm1252_vm5, %v1186_v23, %v1268_v33  ;;  %v922_v50 = vpop.f32.mrf.mxu0  ;;  %v2359_v52 = vadd.f32 %v1829_v38, %v2343_v10  ;;  %vm983_vm8 = vcmp.ge.f32.partialorder %v913_v34, 0.0  ;;  %vm1251_vm9 = vcmp.ge.f32.partialorder %v1181_v42, 0.0 }
 0x202   : > { %v1190_v51 = vpop.f32.mrf.mxu1  ;;  %v2362_v56 = vadd.f32 %v2338_v9, %v922_v50  ;;  %v2366_v62 = vadd.f32 %v1284_v45, %v1016_v44  ;;  %v1267_v2 = vmul.f32 0.01, %v1181_v42  ;;  %vm986_vm10 = vcmp.ge.f32.partialorder %v2356_v48, 0.0 }
 0x203   : > { %v1800_v58 = vpop.f32.mrf.mxu0  ;;  %v1191_v63 = vadd.f32 %v2343_v10, %v1190_v51  ;;  %v2372_v4 = vmul.f32 0.01, %v2356_v48  ;;  %v1281_v8 = vsel %vm1249_vm7, %v1171_v28, %v1265_v46  ;;  %vm1254_vm11 = vcmp.ge.f32.partialorder %v2359_v52, 0.0 }
 0x204   : > { %v1832_v60 = vpop.f32.mrf.mxu1  ;;  %v2377_v11 = vmul.f32 0.01, %v2359_v52  ;;  %v1332_v12 = vsel %vm724_vm1, %v1314_v57, 0.0  ;;  %v2381_v13 = vadd.f32 %v1800_v58, %v2338_v9  ;;  %vm985_vm12 = vcmp.ge.f32.partialorder %v2362_v56, 0.0 }
 0x205   : > { %v932_v5 = vpop.f32.mrf.mxu0  ;;  %v2384_v14 = vadd.f32 %v1832_v60, %v2343_v10  ;;  %1333 = vadd.xlane.f32.xlu0 %v1332_v12  ;;  %v1316_v16 = vmul.f32 %v2366_v62, %v2366_v62  ;;  %v1015_v19 = vsel %vm983_vm8, %v913_v34, %v999_v54  ;;  %v1001_v20 = vmul.f32 0.01, %v2362_v56 }
 0x206   : > { %v1200_v6 = vpop.f32.mrf.mxu1  ;;  %v2388_v15 = vadd.f32 %v2338_v9, %v932_v5  ;;  %vm1253_vm13 = vcmp.ge.f32.partialorder %v1191_v63, 0.0  ;;  %v2397_v22 = vadd.f32 %v1281_v8, %v1013_v0  ;;  %v1269_v23 = vmul.f32 0.01, %v1191_v63 }
 0x207   : > { %v1803_v17 = vpop.f32.mrf.mxu0  ;;  %v2395_v21 = vadd.f32 %v2343_v10, %v1200_v6  ;;  %v1283_v31 = vsel %vm1251_vm9, %v1181_v42, %v1267_v2  ;;  %v2407_v32 = vmul.f32 0.01, %v2381_v13  ;;  %v2410_v33 = vmul.f32 0.01, %v2384_v14 }
 0x208   : > { %v1835_v18 = vpop.f32.mrf.mxu1  ;;  %v2400_v24 = vadd.f32 %v1803_v17, %v2338_v9  ;;  %v1338_v34 = vsel %vm724_vm1, %v1316_v16, 0.0  ;;  %v1313_v36 = vmul.f32 %v2397_v22, %v2397_v22  ;;  %vm988_vm14 = vcmp.ge.f32.partialorder %v2381_v13, 0.0 }
 0x209   : > { %v2403_v26 = vadd.f32 %v1835_v18, %v2343_v10  ;;  %v942_v28 = vpop.f32.mrf.mxu0  ;;  %vm987_vm15 = vcmp.ge.f32.partialorder %v2388_v15, 0.0  ;;  %v1003_v38 = vmul.f32 0.01, %v2388_v15  ;;  %1339 = vadd.xlane.f32.xlu1 %v1338_v34  ;;  %vm1256_vm0 = vcmp.ge.f32.partialorder %v2384_v14, 0.0 }
 0x20a   : > { %v1210_v29 = vpop.f32.mrf.mxu1  ;;  %v2419_v40 = vadd.f32 %v2338_v9, %v942_v28  ;;  %vm1255_vm2 = vcmp.ge.f32.partialorder %v2395_v21, 0.0  ;;  %v1271_v46 = vmul.f32 0.01, %v2395_v21  ;;  %v1329_v50 = vsel %vm724_vm1, %v1313_v36, 0.0 }
 0x20b   : > { %v2422_v42 = vadd.f32 %v2343_v10, %v1210_v29  ;;  %v1806_v44 = vpop.f32.mrf.mxu0  ;;  %v2428_v51 = vadd.f32 %v1283_v31, %v1015_v19  ;;  %1330 = vadd.xlane.f32.xlu0 %v1329_v50  ;;  %v2431_v54 = vmul.f32 0.01, %v2400_v24  ;;  %v2434_v57 = vmul.f32 0.01, %v2403_v26 }
 0x20c   : > { %v1838_v45 = vpop.f32.mrf.mxu1  ;;  %v2437_v58 = vadd.f32 %v1806_v44, %v2338_v9  ;;  %vm989_vm3 = vcmp.ge.f32.partialorder %v2419_v40, 0.0  ;;  %v1005_v5 = vmul.f32 0.01, %v2419_v40  ;;  %v1017_v12 = vsel %vm985_vm12, %v2362_v56, %v1001_v20 }
 0x20d   : > { %v2440_v60 = vadd.f32 %v1838_v45, %v2343_v10  ;;  %v952_v0 = vpop.f32.mrf.mxu0  ;;  %vm1257_vm4 = vcmp.ge.f32.partialorder %v2422_v42, 0.0  ;;  %v1315_v6 = vmul.f32 %v2428_v51, %v2428_v51  ;;  %v1273_v8 = vmul.f32 0.01, %v2422_v42 }
 0x20e   : > { %v1220_v2 = vpop.f32.mrf.mxu1  ;;  %v1285_v16 = vsel %vm1253_vm13, %v1191_v63, %v1269_v23  ;;  %v2453_v17 = vadd.f32 %v2338_v9, %v952_v0  ;;  %v1018_v34 = vsel %vm986_vm10, %v2356_v48, %v2372_v4  ;;  %vm990_vm5 = vcmp.ge.f32.partialorder %v2400_v24, 0.0 }
 0x20f   : > { %v1809_v18 = vpop.f32.mrf.mxu0  ;;  %v1335_v28 = vsel %vm724_vm1, %v1315_v6, 0.0  ;;  %v2456_v29 = vadd.f32 %v1285_v16, %v1017_v12  ;;  %v2459_v31 = vadd.f32 %v2343_v10, %v1220_v2  ;;  %v2467_v56 = vmul.f32 0.01, %v2437_v58 }
 0x210   : > { %v1841_v19 = vpop.f32.mrf.mxu1  ;;  %1336 = vadd.xlane.f32.xlu1 %v1335_v28  ;;  %v2470_v63 = vmul.f32 0.01, %v2440_v60  ;;  %v1286_v20 = vsel %vm1254_vm11, %v2359_v52, %v2377_v11  ;;  %v2477_v23 = vadd.f32 %v1809_v18, %v2338_v9  ;;  %vm1258_vm6 = vcmp.ge.f32.partialorder %v2403_v26, 0.0 }
 0x211   : > { %v962_v36 = vpop.f32.mrf.mxu0  ;;  %v1317_v48 = vmul.f32 %v2456_v29, %v2456_v29  ;;  %vm991_vm7 = vcmp.ge.f32.partialorder %v2453_v17, 0.0  ;;  %v1007_v4 = vmul.f32 0.01, %v2453_v17  ;;  %v2484_v45 = vadd.f32 %v1286_v20, %v1018_v34 }
 0x212   : > { %v1230_v44 = vpop.f32.mrf.mxu1  ;;  %vm992_vm8 = vcmp.ge.f32.partialorder %v2437_v58, 0.0  ;;  %vm1260_vm9 = vcmp.ge.f32.partialorder %v2440_v60, 0.0  ;;  %vm1259_vm10 = vcmp.ge.f32.partialorder %v2459_v31, 0.0  ;;  %v1275_v52 = vmul.f32 0.01, %v2459_v31 }
 0x213   : > { %v2491_v11 = vadd.f32 %v1841_v19, %v2343_v10  ;;  %v1019_v50 = vsel %vm987_vm15, %v2388_v15, %v1003_v38  ;;  %v1812_v0 = vpop.f32.mrf.mxu0  ;;  %v1341_v6 = vsel %vm724_vm1, %v1317_v48, 0.0  ;;  %v1318_v12 = vmul.f32 %v2484_v45, %v2484_v45 }
 0x214   : > { %v1844_v2 = vpop.f32.mrf.mxu1  ;;  %v1287_v16 = vsel %vm1255_vm2, %v2395_v21, %v1271_v46  ;;  %v963_v18 = vadd.f32 %v2338_v9, %v962_v36  ;;  %1342 = vadd.xlane.f32.xlu0 %v1341_v6  ;;  %vm994_vm11 = vcmp.ge.f32.partialorder %v2477_v23, 0.0  ;;  %v1010_v19 = vmul.f32 0.01, %v2477_v23 }
 0x215   : > { %v1278_v15 = vmul.f32 0.01, %v2491_v11  ;;  %v2506_v38 = vadd.f32 %v1287_v16, %v1019_v50  ;;  %v1231_v28 = vadd.f32 %v2343_v10, %v1230_v44  ;;  %v1344_v34 = vsel %vm724_vm1, %v1318_v12, 0.0  ;;  %v972_v46 = vpop.f32.mrf.mxu0 }
 0x216   : > { %vm1262_vm12 = vcmp.ge.f32.partialorder %v2491_v11, 0.0  ;;  %vm993_vm13 = vcmp.ge.f32.partialorder %v963_v18, 0.0  ;;  %v1009_v20 = vmul.f32 0.01, %v963_v18  ;;  %v1020_v21 = vsel %vm988_vm14, %v2381_v13, %v2407_v32  ;;  %v1240_v36 = vpop.f32.mrf.mxu1  ;;  %1345 = vadd.xlane.f32.xlu1 %v1344_v34 }
 0x217   : > { %v1319_v48 = vmul.f32 %v2506_v38, %v2506_v38  ;;  %vm1261_vm15 = vcmp.ge.f32.partialorder %v1231_v28, 0.0  ;;  %v1277_v50 = vmul.f32 0.01, %v1231_v28  ;;  %v1288_v44 = vsel %vm1256_vm0, %v2384_v14, %v2410_v33 }
 0x218   : > { %v2521_v6 = vadd.f32 %v1288_v44, %v1020_v21  ;;  %v978_v12 = vadd.f32 %v1812_v0, %v2338_v9  ;;  %v1246_v16 = vadd.f32 %v1844_v2, %v2343_v10  ;;  %v1021_v13 = vsel %vm989_vm3, %v2419_v40, %v1005_v5 }
 0x219   : > { %v1347_v32 = vsel %vm724_vm1, %v1319_v48, 0.0  ;;  %v1289_v34 = vsel %vm1257_vm4, %v2422_v42, %v1273_v8  ;;  %v973_v7 = vadd.f32 %v2338_v9, %v972_v46  ;;  %v1241_v14 = vadd.f32 %v2343_v10, %v1240_v36 }
 0x21a   : > { %1348 = vadd.xlane.f32.xlu0 %v1347_v32  ;;  %v1320_v33 = vmul.f32 %v2521_v6, %v2521_v6  ;;  %vm996_vm14 = vcmp.ge.f32.partialorder %v978_v12, 0.0  ;;  %v1012_v0 = vmul.f32 0.01, %v978_v12  ;;  %vm1264_vm0 = vcmp.ge.f32.partialorder %v1246_v16, 0.0 }
 0x21b   : > { %v1280_v2 = vmul.f32 0.01, %v1246_v16  ;;  %v2536_v21 = vadd.f32 %v1289_v34, %v1021_v13  ;;  %vm995_vm2 = vcmp.ge.f32.partialorder %v973_v7, 0.0  ;;  %v1011_v40 = vmul.f32 0.01, %v973_v7 }
 0x21c   : > { %v1350_v5 = vsel %vm724_vm1, %v1320_v33, 0.0  ;;  %vm1263_vm3 = vcmp.ge.f32.partialorder %v1241_v14, 0.0  ;;  %v1279_v42 = vmul.f32 0.01, %v1241_v14  ;;  %v1022_v9 = vsel %vm990_vm5, %v2400_v24, %v2431_v54 }
 0x21d   : > { %1351 = vadd.xlane.f32.xlu1 %v1350_v5  ;;  %v1321_v10 = vmul.f32 %v2536_v21, %v2536_v21  ;;  %v1290_v8 = vsel %vm1258_vm6, %v2403_v26, %v2434_v57  ;;  %v1023_v46 = vsel %vm991_vm7, %v2453_v17, %v1007_v4  ;;  %v1291_v36 = vsel %vm1259_vm10, %v2459_v31, %v1275_v52 }
 0x21e   : > { %v2555_v48 = vadd.f32 %v1290_v8, %v1022_v9  ;;  %v2557_v24 = vadd.f32 %v1291_v36, %v1023_v46  ;;  %v1024_v54 = vsel %vm992_vm8, %v2437_v58, %v2467_v56  ;;  %v1292_v26 = vsel %vm1260_vm9, %v2440_v60, %v2470_v63 }
 0x21f   : > { %v1353_v57 = vsel %vm724_vm1, %v1321_v10, 0.0  ;;  %v2568_v17 = vadd.f32 %v1292_v26, %v1024_v54  ;;  %v1025_v31 = vsel %vm993_vm13, %v963_v18, %v1009_v20  ;;  %v1293_v4 = vsel %vm1261_vm15, %v1231_v28, %v1277_v50 }
 0x220   : > { %1354 = vadd.xlane.f32.xlu0 %v1353_v57  ;;  %v1322_v52 = vmul.f32 %v2555_v48, %v2555_v48  ;;  %v1323_v58 = vmul.f32 %v2557_v24, %v2557_v24  ;;  %v2576_v56 = vadd.f32 %v1293_v4, %v1025_v31  ;;  %v1026_v60 = vsel %vm994_vm11, %v2477_v23, %v1010_v19 }
 0x221   : > { %v1324_v63 = vmul.f32 %v2568_v17, %v2568_v17  ;;  %v1294_v18 = vsel %vm1262_vm12, %v2491_v11, %v1278_v15  ;;  %v1027_v28 = vsel %vm995_vm2, %v973_v7, %v1011_v40  ;;  %v1295_v20 = vsel %vm1263_vm3, %v1241_v14, %v1279_v42 }
 0x222   : > { %v1356_v50 = vsel %vm724_vm1, %v1322_v52, 0.0  ;;  %v1359_v44 = vsel %vm724_vm1, %v1323_v58, 0.0  ;;  %v1325_v13 = vmul.f32 %v2576_v56, %v2576_v56  ;;  %v2592_v32 = vadd.f32 %v1294_v18, %v1026_v60 }
 0x223   : > { %1357 = vadd.xlane.f32.xlu1 %v1356_v50  ;;  %v2594_v23 = vadd.f32 %v1295_v20, %v1027_v28  ;;  %v1028_v19 = vsel %vm996_vm14, %v978_v12, %v1012_v0  ;;  %v1296_v11 = vsel %vm1264_vm0, %v1246_v16, %v1280_v2  ;;  %v1362_v34 = vsel %vm724_vm1, %v1324_v63, 0.0 }
 0x224   : > { %1360 = vadd.xlane.f32.xlu0 %v1359_v44  ;;  %v1365_v7 = vsel %vm724_vm1, %v1325_v13, 0.0  ;;  %v1326_v14 = vmul.f32 %v2592_v32, %v2592_v32  ;;  %v2604_v33 = vadd.f32 %v1296_v11, %v1028_v19  ;;  %vm1505_vm4 = vcmask 523264  }
 0x225   : > { %v1327_v15 = vmul.f32 %v2594_v23, %v2594_v23 }
 0x226   : > { %v1368_v12 = vsel %vm724_vm1, %v1326_v14, 0.0  ;;  %v1328_v16 = vmul.f32 %v2604_v33, %v2604_v33 }
 0x227   : > { %1363 = vadd.xlane.f32.xlu1 %v1362_v34  ;;  %v1371_v40 = vsel %vm724_vm1, %v1327_v15, 0.0 }
 0x228   : > { %1366 = vadd.xlane.f32.xlu0 %v1365_v7  ;;  %v1374_v0 = vsel %vm724_vm1, %v1328_v16, 0.0 }
 0x22b   : > { %1369 = vadd.xlane.f32.xlu1 %v1368_v12 }
 0x22c   : > { %1372 = vadd.xlane.f32.xlu0 %v1371_v40 }
 0x22f   : > { %1375 = vadd.xlane.f32.xlu1 %v1374_v0 }
 0x28e   : > { %v1334_v2 = vpop.xlane.xlu0 %1333 }
 0x28f   : > { %v1378_v5 = vmax.f32 %v1334_v2, 1e-24 }
 0x291   : > { %1935 = vrsqrt.f32 %v1378_v5 }
 0x292   : > { %v1340_v42 = vpop.xlane.xlu1 %1339 }
 0x293   : > { %v1380_v9 = vmax.f32 %v1340_v42, 1e-24 }
 0x294   : > { %v1331_v10 = vpop.xlane.xlu0 %1330 }
 0x295   : > { %1937 = vrsqrt.f32 %v1380_v9  ;;  %v1377_v8 = vmax.f32 %v1331_v10, 1e-24 }
 0x297   : > { %1939 = vrsqrt.f32 %v1377_v8 }
 0x299   : > { %v1337_v46 = vpop.xlane.xlu1 %1336 }
 0x29a   : > { %v1379_v36 = vmax.f32 %v1337_v46, 1e-24 }
 0x29c   : > { %1941 = vrsqrt.f32 %v1379_v36 }
 0x29d   : > { %v1343_v54 = vpop.xlane.xlu0 %1342 }
 0x29e   : > { %v1381_v26 = vmax.f32 %v1343_v54, 1e-24  ;;  %v1936_v57 = vpop.eup %1935 }
 0x29f   : > { %v1346_v31 = vpop.xlane.xlu1 %1345  ;;  %v1410_v52 = vmul.f32 %v1936_v57, %v2352_v39 }
 0x2a0   : > { %1943 = vrsqrt.f32 %v1381_v26  ;;  %v1382_v4 = vmax.f32 %v1346_v31, 1e-24 }
 0x2a1   : > { %1443 = vrot.lane.b32.xlu1 %v1410_v52, %s2024_s17 }
 0x2a2   : > { %1945 = vrsqrt.f32 %v1382_v4  ;;  %v1938_v60 = vpop.eup %1937 }
 0x2a3   : > { %v1349_v58 = vpop.xlane.xlu0 %1348  ;;  %v1412_v18 = vmul.f32 %v1938_v60, %v2366_v62 }
 0x2a4   : > { %v1383_v63 = vmax.f32 %v1349_v58, 1e-24  ;;  %v1940_v28 = vpop.eup %1939 }
 0x2a5   : > { %1447 = vrot.lane.b32.xlu1 %v1412_v18, %s2024_s17  ;;  %v1409_v44 = vmul.f32 %v1940_v28, %v2397_v22 }
 0x2a6   : > { %1947 = vrsqrt.f32 %v1383_v63  ;;  %v1352_v20 = vpop.xlane.xlu1 %1351 }
 0x2a7   : > { %v1384_v50 = vmax.f32 %v1352_v20, 1e-24  ;;  %1441 = vrot.lane.b32.xlu0 %v1409_v44, %s2024_s17 }
 0x2a9   : > { %1949 = vrsqrt.f32 %v1384_v50  ;;  %v1355_v13 = vpop.xlane.xlu0 %1354  ;;  %v1942_v39 = vpop.eup %1941 }
 0x2aa   : > { %v1385_v19 = vmax.f32 %v1355_v13, 1e-24  ;;  %v1411_v11 = vmul.f32 %v1942_v39, %v2428_v51 }
 0x2ac   : > { %1951 = vrsqrt.f32 %v1385_v19  ;;  %v1358_v7 = vpop.xlane.xlu1 %1357  ;;  %1445 = vrot.lane.b32.xlu1 %v1411_v11, %s2024_s17 }
 0x2ad   : > { %v1386_v15 = vmax.f32 %v1358_v7, 1e-24  ;;  %v1361_v62 = vpop.xlane.xlu0 %1360  ;;  %v1944_v34 = vpop.eup %1943 }
 0x2ae   : > { %v1387_v14 = vmax.f32 %v1361_v62, 1e-24  ;;  %v1413_v40 = vmul.f32 %v1944_v34, %v2456_v29 }
 0x2af   : > { %1953 = vrsqrt.f32 %v1386_v15  ;;  %v1946_v22 = vpop.eup %1945 }
 0x2b0   : > { %1955 = vrsqrt.f32 %v1387_v14  ;;  %v1364_v12 = vpop.xlane.xlu1 %1363  ;;  %1449 = vrot.lane.b32.xlu0 %v1413_v40, %s2024_s17  ;;  %v1414_v51 = vmul.f32 %v1946_v22, %v2484_v45 }
 0x2b1   : > { %v1388_v16 = vmax.f32 %v1364_v12, 1e-24  ;;  %v1367_v0 = vpop.xlane.xlu0 %1366 }
 0x2b2   : > { %v1389_v2 = vmax.f32 %v1367_v0, 1e-24  ;;  %1451 = vrot.lane.b32.xlu1 %v1414_v51, %s2024_s17 }
 0x2b3   : > { %v1948_v5 = vpop.eup %1947  ;;  %1957 = vrsqrt.f32 %v1388_v16  ;;  %v2738_v16 = vld [vmem:[#allocation4_spill] sm:$0xff] }
 0x2b4   : > { %1959 = vrsqrt.f32 %v1389_v2  ;;  %v1370_v42 = vpop.xlane.xlu1 %1369  ;;  %v1415_v9 = vmul.f32 %v1948_v5, %v2506_v38 }
 0x2b5   : > { %v1390_v10 = vmax.f32 %v1370_v42, 1e-24  ;;  %v1373_v29 = vpop.xlane.xlu0 %1372 }
 0x2b6   : > { %v1950_v8 = vpop.eup %1949  ;;  %v1391_v46 = vmax.f32 %v1373_v29, 1e-24  ;;  %1453 = vrot.lane.b32.xlu0 %v1415_v9, %s2024_s17 }
 0x2b7   : > { %1961 = vrsqrt.f32 %v1390_v10  ;;  %v1416_v36 = vmul.f32 %v1950_v8, %v2521_v6 }
 0x2b8   : > { %1963 = vrsqrt.f32 %v1391_v46  ;;  %v1376_v45 = vpop.xlane.xlu1 %1375 }
 0x2b9   : > { %v1952_v54 = vpop.eup %1951  ;;  %v1392_v26 = vmax.f32 %v1376_v45, 1e-24  ;;  %1455 = vrot.lane.b32.xlu1 %v1416_v36, %s2024_s17 }
 0x2ba   : > { %v1417_v57 = vmul.f32 %v1952_v54, %v2536_v21 }
 0x2bb   : > { %1965 = vrsqrt.f32 %v1392_v26 }
 0x2bc   : > { %v1954_v31 = vpop.eup %1953  ;;  %1457 = vrot.lane.b32.xlu0 %v1417_v57, %s2024_s17 }
 0x2bd   : > { %v1956_v38 = vpop.eup %1955  ;;  %v1418_v4 = vmul.f32 %v1954_v31, %v2555_v48 }
 0x2be   : > { %v1419_v52 = vmul.f32 %v1956_v38, %v2557_v24 }
 0x2bf   : > { %1459 = vrot.lane.b32.xlu1 %v1418_v4, %s2024_s17 }
 0x2c0   : > { %v1958_v6 = vpop.eup %1957  ;;  %1461 = vrot.lane.b32.xlu0 %v1419_v52, %s2024_s17 }
 0x2c1   : > { %v1960_v58 = vpop.eup %1959  ;;  %v1420_v60 = vmul.f32 %v1958_v6, %v2568_v17 }
 0x2c2   : > { %v1421_v21 = vmul.f32 %v1960_v58, %v2576_v56 }
 0x2c3   : > { %1463 = vrot.lane.b32.xlu1 %v1420_v60, %s2024_s17 }
 0x2c4   : > { %v1962_v63 = vpop.eup %1961  ;;  %1465 = vrot.lane.b32.xlu0 %v1421_v21, %s2024_s17 }
 0x2c5   : > { %v1964_v48 = vpop.eup %1963  ;;  %v1422_v24 = vmul.f32 %v1962_v63, %v2592_v32 }
 0x2c6   : > { %v1423_v18 = vmul.f32 %v1964_v48, %v2594_v23 }
 0x2c7   : > { %1467 = vrot.lane.b32.xlu1 %v1422_v24, %s2024_s17 }
 0x2c8   : > { %v1966_v28 = vpop.eup %1965  ;;  %1469 = vrot.lane.b32.xlu0 %v1423_v18, %s2024_s17 }
 0x2c9   : > { %v1424_v17 = vmul.f32 %v1966_v28, %v2604_v33 }
 0x2cb   : > { %1471 = vrot.lane.b32.xlu1 %v1424_v17, %s2024_s17 }
 0x313   : > { %v1444_v56 = vpop.permute.xlu1 %1443 }
 0x314   : > { %v1490_v20 = vsel %vm724_vm1, %v2240_v27, %v1444_v56 }
 0x315   : > { %1507 = vst.msk [vmem:[%s2161_s10 + $0x8] sm:$0xff] %vm1505_vm4, %v1490_v20 }
 0x317   : > { %v1448_v32 = vpop.permute.xlu1 %1447 }
 0x318   : > { %v1492_v23 = vsel %vm724_vm1, %v2252_v35, %v1448_v32 }
 0x319   : > { %1509 = vst.msk [vmem:[%s2161_s10 + $0x18] sm:$0xff] %vm1505_vm4, %v1492_v23  ;;  %v1442_v50 = vpop.permute.xlu0 %1441 }
 0x31a   : > { %v1489_v33 = vsel %vm724_vm1, %v2237_v25, %v1442_v50 }
 0x31b   : > { %1506 = vst.msk [vmem:[%s2161_s10] sm:$0xff] %vm1505_vm4, %v1489_v33 }
 0x31e   : > { %v1446_v44 = vpop.permute.xlu1 %1445 }
 0x31f   : > { %v1491_v27 = vsel %vm724_vm1, %v2246_v30, %v1446_v44 }
 0x320   : > { %1508 = vst.msk [vmem:[%s2161_s10 + $0x10] sm:$0xff] %vm1505_vm4, %v1491_v27 }
 0x322   : > { %v1450_v13 = vpop.permute.xlu0 %1449 }
 0x323   : > { %v1493_v35 = vsel %vm724_vm1, %v2256_v37, %v1450_v13 }
 0x324   : > { %1510 = vst.msk [vmem:[%s2161_s10 + $0x20] sm:$0xff] %vm1505_vm4, %v1493_v35  ;;  %v1452_v39 = vpop.permute.xlu1 %1451 }
 0x325   : > { %v1494_v25 = vsel %vm724_vm1, %v2266_v41, %v1452_v39 }
 0x326   : > { %1511 = vst.msk [vmem:[%s2161_s10 + $0x28] sm:$0xff] %vm1505_vm4, %v1494_v25 }
 0x328   : > { %v1454_v19 = vpop.permute.xlu0 %1453 }
 0x329   : > { %v1495_v30 = vsel %vm724_vm1, %v2269_v43, %v1454_v19 }
 0x32a   : > { %1512 = vst.msk [vmem:[%s2161_s10 + $0x30] sm:$0xff] %vm1505_vm4, %v1495_v30 }
 0x32b   : > { %v1456_v11 = vpop.permute.xlu1 %1455 }
 0x32c   : > { %v1496_v37 = vsel %vm724_vm1, %v2278_v47, %v1456_v11 }
 0x32d   : > { %1513 = vst.msk [vmem:[%s2161_s10 + $0x38] sm:$0xff] %vm1505_vm4, %v1496_v37 }
 0x32e   : > { %v1458_v7 = vpop.permute.xlu0 %1457 }
 0x32f   : > { %v1497_v41 = vsel %vm724_vm1, %v2281_v49, %v1458_v7 }
 0x330   : > { %1514 = vst.msk [vmem:[%s2161_s10 + $0x40] sm:$0xff] %vm1505_vm4, %v1497_v41 }
 0x331   : > { %v1460_v15 = vpop.permute.xlu1 %1459 }
 0x332   : > { %v1498_v43 = vsel %vm724_vm1, %v2290_v53, %v1460_v15  ;;  %v1462_v62 = vpop.permute.xlu0 %1461 }
 0x333   : > { %1515 = vst.msk [vmem:[%s2161_s10 + $0x48] sm:$0xff] %vm1505_vm4, %v1498_v43  ;;  %v1499_v47 = vsel %vm724_vm1, %v2293_v55, %v1462_v62 }
 0x334   : > { %1516 = vst.msk [vmem:[%s2161_s10 + $0x50] sm:$0xff] %vm1505_vm4, %v1499_v47 }
 0x335   : > { %v1464_v34 = vpop.permute.xlu1 %1463 }
 0x336   : > { %v1500_v49 = vsel %vm724_vm1, %v2302_v59, %v1464_v34  ;;  %v1466_v14 = vpop.permute.xlu0 %1465 }
 0x337   : > { %1517 = vst.msk [vmem:[%s2161_s10 + $0x58] sm:$0xff] %vm1505_vm4, %v1500_v49  ;;  %v1501_v53 = vsel %vm724_vm1, %v2305_v61, %v1466_v14 }
 0x338   : > { %1518 = vst.msk [vmem:[%s2161_s10 + $0x60] sm:$0xff] %vm1505_vm4, %v1501_v53 }
 0x339   : > { %v1468_v40 = vpop.permute.xlu1 %1467 }
 0x33a   : > { %v1502_v22 = vsel %vm724_vm1, %v2314_v1, %v1468_v40  ;;  %v1470_v55 = vpop.permute.xlu0 %1469 }
 0x33b   : > { %1519 = vst.msk [vmem:[%s2161_s10 + $0x68] sm:$0xff] %vm1505_vm4, %v1502_v22  ;;  %v1503_v12 = vsel %vm724_vm1, %v2317_v3, %v1470_v55 }
 0x33c   : > { %1520 = vst.msk [vmem:[%s2161_s10 + $0x70] sm:$0xff] %vm1505_vm4, %v1503_v12 }
 0x33d   : > { %v1472_v59 = vpop.permute.xlu1 %1471 }
 0x33e   : > { %v1504_v0 = vsel %vm724_vm1, %v2738_v16, %v1472_v59 }
 0x33f   : > { %1521 = vst.msk [vmem:[%s2161_s10 + $0x78] sm:$0xff] %vm1505_vm4, %v1504_v0 }
 0x340 PF: > { %s17_s30 = sadd.s32 1, %s2021_s30   ;;  %s2739_s24 = smov %s2001_s25 }
 0x341   : > { %p14_p0 = scmp.ge.s32.totalorder %s17_s30, 6   ;;  %s2740_s25 = smov %s2116_s14 }
 0x342   : > { %s2741_s26 = smov %s2013_s28  ;;  %s2742_s27 = smov %s2017_s29 }
 0x343   : > { %s2743_s28 = smov %s2746_s8  ;;  %s2744_s29 = smov %s2750_s9 }
 0x344   :  { %16 = sbr.rel (!%p14_p0) target bundleno = 4 (0x4), region = 138 }

</bundles_post_ra>
